<compile_context>
chip_gen: v7x
topology: tpu7x:2x2x1
jax: 0.10.0
libtpu: 0.0.40
codegen_flags: <defaults>
</compile_context>

<pallas_src>
import jax
import jax.numpy as jnp
from jax.experimental import pallas as pl
from jax.experimental.pallas import tpu as pltpu

LANE = 128
_VMEM = pltpu.MemorySpace.VMEM


def _add3_kernel(x308_ref, x294_ref, x323_ref, out_ref):
    # x309 = x308 + x294 ; x324 = x323 + x309   (fused, single VPU pass)
    out_ref[...] = x323_ref[...] + (x308_ref[...] + x294_ref[...])


def _add_add_impl(x308, x294, x323):
    orig_shape = x308.shape
    dtype = x308.dtype
    total = 1
    for d in orig_shape:
        total *= d

    # Lane-dense slab. For this module total == 31360 == 245 * 128, so the
    # pad branch is dead; it only exists for generality and fuses under jit.
    padded = ((total + LANE - 1) // LANE) * LANE
    rows = padded // LANE

    def to_slab(x):
        flat = x.reshape(-1)  # metadata-only for row-major layouts
        if padded != total:
            flat = jnp.pad(flat, (0, padded - total))
        return flat.reshape(rows, LANE)

    a, b, c = to_slab(x308), to_slab(x294), to_slab(x323)

    elem_bytes = jnp.dtype(dtype).itemsize
    cost = pl.CostEstimate(
        flops=2 * total,              # two adds per element
        transcendentals=0,
        bytes_accessed=4 * total * elem_bytes,  # 3 reads + 1 write
    )

    out_slab = pl.pallas_call(
        _add3_kernel,
        out_shape=jax.ShapeDtypeStruct((rows, LANE), dtype),
        in_specs=[
            pl.BlockSpec(memory_space=_VMEM),
            pl.BlockSpec(memory_space=_VMEM),
            pl.BlockSpec(memory_space=_VMEM),
        ],
        out_specs=pl.BlockSpec(memory_space=_VMEM),
        # Output reuses x308's slab buffer; real (not defensive-copied)
        # because the jit wrapper donates x308.
        input_output_aliases={0: 0},
        cost_estimate=cost,
    )(a, b, c)

    if padded != total:
        out_slab = out_slab.reshape(-1)[:total]
    return out_slab.reshape(orig_shape)


# Donate x308 (argument 0): it is dead after this op in the source graph, so
# the pallas_call alias {0: 0} becomes a true in-place update of its HBM
# buffer instead of being ignored / copied around by XLA.
add_add = jax.jit(_add_add_impl, donate_argnums=0)


if __name__ == "__main__":
    key = jax.random.PRNGKey(0)
    k1, k2, k3 = jax.random.split(key, 3)
    shape = (1, 160, 14, 14)  # matches the module's tensors
    x294 = jax.random.normal(k1, shape, dtype=jnp.float32)
    x308 = jax.random.normal(k2, shape, dtype=jnp.float32)
    x323 = jax.random.normal(k3, shape, dtype=jnp.float32)

    # Compute the reference BEFORE calling the kernel: x308 is donated to
    # add_add, so its buffer must not be read afterwards.
    ref = x323 + (x308 + x294)
    ref = jax.block_until_ready(ref)

    out = add_add(x308, x294, x323)
    out = jax.block_until_ready(out)

    assert out.shape == shape
    assert jnp.allclose(out, ref, atol=1e-6), "mismatch vs reference"
    print("KERNEL_OK")
</pallas_src>

<mosaic_0001>
module attributes {stable_mosaic.version = 11 : i64} {
  func.func @_add3_kernel(%arg0: memref<245x128xf32, #tpu.memory_space<vmem>>, %arg1: memref<245x128xf32, #tpu.memory_space<vmem>>, %arg2: memref<245x128xf32, #tpu.memory_space<vmem>>, %arg3: memref<245x128xf32, #tpu.memory_space<vmem>>) attributes {dimension_semantics = [], scalar_prefetch = 0 : i64, scratch_operands = 0 : i64, tpu.core_type = #tpu.core_type<tc>} {
    %c0 = arith.constant 0 : index
    %c0_0 = arith.constant 0 : index
    %0 = vector.load %arg2[%c0, %c0_0] : memref<245x128xf32, #tpu.memory_space<vmem>>, vector<245x128xf32>
    %c0_1 = arith.constant 0 : index
    %c0_2 = arith.constant 0 : index
    %1 = vector.load %arg0[%c0_1, %c0_2] : memref<245x128xf32, #tpu.memory_space<vmem>>, vector<245x128xf32>
    %c0_3 = arith.constant 0 : index
    %c0_4 = arith.constant 0 : index
    %2 = vector.load %arg1[%c0_3, %c0_4] : memref<245x128xf32, #tpu.memory_space<vmem>>, vector<245x128xf32>
    %3 = arith.addf %1, %2 : vector<245x128xf32>
    %4 = arith.addf %0, %3 : vector<245x128xf32>
    %c0_5 = arith.constant 0 : index
    %c0_6 = arith.constant 0 : index
    %5 = vector.load %arg3[%c0_5, %c0_6] : memref<245x128xf32, #tpu.memory_space<vmem>>, vector<245x128xf32>
    tpu.vector_store %arg3[%c0_5, %c0_6], %4 {strides = array<i32>} : memref<245x128xf32, #tpu.memory_space<vmem>>, vector<245x128xf32>,
    return
  }
}

</mosaic_0001>

<bundles_post_ra>
// kernel: _add_add_impl.1
= control target key start
LH: loop header
LB: loop body
LE: loop exit
PB: predicated region body
PF: predicated region fallthrough
CT: control target
= control target key end

     0   :  { %s596_s0 = inlined_call_operand.vmem [shape: f32[245,128], index: 0, kind: input, shape index: {}, may-alias: {0,3}]   ;;  %s597_s1 = inlined_call_operand.vmem [shape: f32[245,128], index: 1, kind: input, shape index: {}]   ;;  %s598_s2 = inlined_call_operand.vmem [shape: f32[245,128], index: 2, kind: input, shape index: {}]   ;;  %s599_s3 = inlined_call_operand.vmem [shape: f32[245,128], index: 3, kind: output, shape index: {}, may-alias: {0,3}]  }
   0x1   :  { %v14_v0 = vld [vmem:[%s598_s2] sm:$0xff]  ;;  %v15_v4 = vld [vmem:[%s598_s2 + $0x8] sm:$0xff]  ;;  %v16_v8 = vld [vmem:[%s598_s2 + $0x10] sm:$0xff] }
   0x2   :  { %v45_v1 = vld [vmem:[%s596_s0] sm:$0xff]  ;;  %v46_v5 = vld [vmem:[%s596_s0 + $0x8] sm:$0xff]  ;;  %v47_v9 = vld [vmem:[%s596_s0 + $0x10] sm:$0xff] }
   0x3   :  { %v76_v2 = vld [vmem:[%s597_s1] sm:$0xff]  ;;  %v77_v6 = vld [vmem:[%s597_s1 + $0x8] sm:$0xff]  ;;  %v78_v10 = vld [vmem:[%s597_s1 + $0x10] sm:$0xff] }
   0x4   :  { %v107_v3 = vadd.f32 %v76_v2, %v45_v1  ;;  %v108_v7 = vadd.f32 %v77_v6, %v46_v5  ;;  %v109_v12 = vadd.f32 %v78_v10, %v47_v9  ;;  %v17_v13 = vld [vmem:[%s598_s2 + $0x18] sm:$0xff]  ;;  %v18_v18 = vld [vmem:[%s598_s2 + $0x20] sm:$0xff]  ;;  %v19_v23 = vld [vmem:[%s598_s2 + $0x28] sm:$0xff] }
   0x5   :  { %v48_v14 = vld [vmem:[%s596_s0 + $0x18] sm:$0xff]  ;;  %v49_v19 = vld [vmem:[%s596_s0 + $0x20] sm:$0xff]  ;;  %v81_v25 = vld [vmem:[%s597_s1 + $0x28] sm:$0xff] }
   0x6   :  { %v138_v11 = vadd.f32 %v107_v3, %v14_v0  ;;  %v79_v15 = vld [vmem:[%s597_s1 + $0x18] sm:$0xff]  ;;  %v139_v16 = vadd.f32 %v108_v7, %v15_v4  ;;  %v80_v20 = vld [vmem:[%s597_s1 + $0x20] sm:$0xff]  ;;  %v140_v21 = vadd.f32 %v109_v12, %v16_v8  ;;  %v20_v28 = vld [vmem:[%s598_s2 + $0x30] sm:$0xff] }
   0x7   :  { %v110_v17 = vadd.f32 %v79_v15, %v48_v14  ;;  %v111_v22 = vadd.f32 %v80_v20, %v49_v19  ;;  %v82_v30 = vld [vmem:[%s597_s1 + $0x30] sm:$0xff]  ;;  %v21_v33 = vld [vmem:[%s598_s2 + $0x38] sm:$0xff]  ;;  %v22_v38 = vld [vmem:[%s598_s2 + $0x40] sm:$0xff] }
   0x8   :  { %169 = vst [vmem:[%s599_s3] sm:$0xff] %v138_v11  ;;  %v83_v35 = vld [vmem:[%s597_s1 + $0x38] sm:$0xff]  ;;  %v84_v40 = vld [vmem:[%s597_s1 + $0x40] sm:$0xff]  ;;  %v23_v43 = vld [vmem:[%s598_s2 + $0x48] sm:$0xff] }
   0x9   :  { %v141_v26 = vadd.f32 %v110_v17, %v17_v13  ;;  %v142_v31 = vadd.f32 %v111_v22, %v18_v18  ;;  %v85_v45 = vld [vmem:[%s597_s1 + $0x48] sm:$0xff]  ;;  %v24_v48 = vld [vmem:[%s598_s2 + $0x50] sm:$0xff]  ;;  %v25_v53 = vld [vmem:[%s598_s2 + $0x58] sm:$0xff] }
   0xa   :  { %v86_v50 = vld [vmem:[%s597_s1 + $0x50] sm:$0xff]  ;;  %v87_v55 = vld [vmem:[%s597_s1 + $0x58] sm:$0xff]  ;;  %v26_v58 = vld [vmem:[%s598_s2 + $0x60] sm:$0xff] }
   0xb   :  { %v88_v60 = vld [vmem:[%s597_s1 + $0x60] sm:$0xff]  ;;  %v27_v63 = vld [vmem:[%s598_s2 + $0x68] sm:$0xff]  ;;  %v28_v4 = vld [vmem:[%s598_s2 + $0x70] sm:$0xff] }
   0xc   :  { %v89_v1 = vld [vmem:[%s597_s1 + $0x68] sm:$0xff]  ;;  %v90_v6 = vld [vmem:[%s597_s1 + $0x70] sm:$0xff]  ;;  %v29_v9 = vld [vmem:[%s598_s2 + $0x78] sm:$0xff] }
   0xd   :  { %v91_v11 = vld [vmem:[%s597_s1 + $0x78] sm:$0xff]  ;;  %v30_v14 = vld [vmem:[%s598_s2 + $0x80] sm:$0xff]  ;;  %v31_v19 = vld [vmem:[%s598_s2 + $0x88] sm:$0xff] }
   0xf   :  { %v50_v24 = vld [vmem:[%s596_s0 + $0x28] sm:$0xff] }
  0x10   :  { %170 = vst [vmem:[%s599_s3 + $0x8] sm:$0xff] %v139_v16  ;;  %v112_v27 = vadd.f32 %v81_v25, %v50_v24  ;;  %v92_v16 = vld [vmem:[%s597_s1 + $0x80] sm:$0xff]  ;;  %v32_v24 = vld [vmem:[%s598_s2 + $0x90] sm:$0xff] }
  0x12   :  { %v143_v36 = vadd.f32 %v112_v27, %v19_v23 }
  0x17   :  { %v51_v29 = vld [vmem:[%s596_s0 + $0x30] sm:$0xff] }
  0x18   :  { %171 = vst [vmem:[%s599_s3 + $0x10] sm:$0xff] %v140_v21  ;;  %v113_v32 = vadd.f32 %v82_v30, %v51_v29  ;;  %v93_v21 = vld [vmem:[%s597_s1 + $0x88] sm:$0xff]  ;;  %v33_v29 = vld [vmem:[%s598_s2 + $0x98] sm:$0xff] }
  0x1a   :  { %v144_v41 = vadd.f32 %v113_v32, %v20_v28 }
  0x1f   :  { %v52_v34 = vld [vmem:[%s596_s0 + $0x38] sm:$0xff] }
  0x20   :  { %172 = vst [vmem:[%s599_s3 + $0x18] sm:$0xff] %v141_v26  ;;  %v114_v37 = vadd.f32 %v83_v35, %v52_v34  ;;  %v94_v26 = vld [vmem:[%s597_s1 + $0x90] sm:$0xff]  ;;  %v34_v34 = vld [vmem:[%s598_s2 + $0xa0] sm:$0xff] }
  0x22   :  { %v145_v46 = vadd.f32 %v114_v37, %v21_v33 }
  0x27   :  { %v53_v39 = vld [vmem:[%s596_s0 + $0x40] sm:$0xff] }
  0x28   :  { %173 = vst [vmem:[%s599_s3 + $0x20] sm:$0xff] %v142_v31  ;;  %v115_v42 = vadd.f32 %v84_v40, %v53_v39  ;;  %v95_v31 = vld [vmem:[%s597_s1 + $0x98] sm:$0xff]  ;;  %v35_v39 = vld [vmem:[%s598_s2 + $0xa8] sm:$0xff] }
  0x2a   :  { %v146_v51 = vadd.f32 %v115_v42, %v22_v38 }
  0x2f   :  { %v54_v44 = vld [vmem:[%s596_s0 + $0x48] sm:$0xff] }
  0x30   :  { %174 = vst [vmem:[%s599_s3 + $0x28] sm:$0xff] %v143_v36  ;;  %v116_v47 = vadd.f32 %v85_v45, %v54_v44  ;;  %v96_v36 = vld [vmem:[%s597_s1 + $0xa0] sm:$0xff]  ;;  %v36_v44 = vld [vmem:[%s598_s2 + $0xb0] sm:$0xff] }
  0x32   :  { %v147_v56 = vadd.f32 %v116_v47, %v23_v43 }
  0x37   :  { %v55_v49 = vld [vmem:[%s596_s0 + $0x50] sm:$0xff] }
  0x38   :  { %175 = vst [vmem:[%s599_s3 + $0x30] sm:$0xff] %v144_v41  ;;  %v117_v52 = vadd.f32 %v86_v50, %v55_v49  ;;  %v97_v41 = vld [vmem:[%s597_s1 + $0xa8] sm:$0xff]  ;;  %v37_v49 = vld [vmem:[%s598_s2 + $0xb8] sm:$0xff] }
  0x3a   :  { %v148_v61 = vadd.f32 %v117_v52, %v24_v48 }
  0x3f   :  { %v56_v54 = vld [vmem:[%s596_s0 + $0x58] sm:$0xff] }
  0x40   :  { %176 = vst [vmem:[%s599_s3 + $0x38] sm:$0xff] %v145_v46  ;;  %v118_v57 = vadd.f32 %v87_v55, %v56_v54  ;;  %v98_v46 = vld [vmem:[%s597_s1 + $0xb0] sm:$0xff]  ;;  %v38_v54 = vld [vmem:[%s598_s2 + $0xc0] sm:$0xff] }
  0x42   :  { %v149_v2 = vadd.f32 %v118_v57, %v25_v53 }
  0x47   :  { %v57_v59 = vld [vmem:[%s596_s0 + $0x60] sm:$0xff] }
  0x48   :  { %177 = vst [vmem:[%s599_s3 + $0x40] sm:$0xff] %v146_v51  ;;  %v119_v62 = vadd.f32 %v88_v60, %v57_v59  ;;  %v99_v51 = vld [vmem:[%s597_s1 + $0xb8] sm:$0xff]  ;;  %v39_v59 = vld [vmem:[%s598_s2 + $0xc8] sm:$0xff] }
  0x4a   :  { %v150_v7 = vadd.f32 %v119_v62, %v26_v58 }
  0x4f   :  { %v58_v0 = vld [vmem:[%s596_s0 + $0x68] sm:$0xff] }
  0x50   :  { %178 = vst [vmem:[%s599_s3 + $0x48] sm:$0xff] %v147_v56  ;;  %v120_v3 = vadd.f32 %v89_v1, %v58_v0  ;;  %v100_v56 = vld [vmem:[%s597_s1 + $0xc0] sm:$0xff]  ;;  %v40_v0 = vld [vmem:[%s598_s2 + $0xd0] sm:$0xff] }
  0x52   :  { %v151_v12 = vadd.f32 %v120_v3, %v27_v63 }
  0x57   :  { %v59_v5 = vld [vmem:[%s596_s0 + $0x70] sm:$0xff] }
  0x58   :  { %179 = vst [vmem:[%s599_s3 + $0x50] sm:$0xff] %v148_v61  ;;  %v121_v8 = vadd.f32 %v90_v6, %v59_v5  ;;  %v101_v61 = vld [vmem:[%s597_s1 + $0xc8] sm:$0xff]  ;;  %v41_v5 = vld [vmem:[%s598_s2 + $0xd8] sm:$0xff] }
  0x5a   :  { %v152_v17 = vadd.f32 %v121_v8, %v28_v4 }
  0x5f   :  { %v60_v10 = vld [vmem:[%s596_s0 + $0x78] sm:$0xff] }
  0x60   :  { %180 = vst [vmem:[%s599_s3 + $0x58] sm:$0xff] %v149_v2  ;;  %v122_v13 = vadd.f32 %v91_v11, %v60_v10  ;;  %v102_v2 = vld [vmem:[%s597_s1 + $0xd0] sm:$0xff]  ;;  %v42_v10 = vld [vmem:[%s598_s2 + $0xe0] sm:$0xff] }
  0x62   :  { %v153_v22 = vadd.f32 %v122_v13, %v29_v9 }
  0x67   :  { %v61_v15 = vld [vmem:[%s596_s0 + $0x80] sm:$0xff] }
  0x68   :  { %181 = vst [vmem:[%s599_s3 + $0x60] sm:$0xff] %v150_v7  ;;  %v123_v18 = vadd.f32 %v92_v16, %v61_v15  ;;  %v103_v7 = vld [vmem:[%s597_s1 + $0xd8] sm:$0xff]  ;;  %v43_v15 = vld [vmem:[%s598_s2 + $0xe8] sm:$0xff] }
  0x6a   :  { %v154_v27 = vadd.f32 %v123_v18, %v30_v14 }
  0x6f   :  { %v62_v20 = vld [vmem:[%s596_s0 + $0x88] sm:$0xff] }
  0x70   :  { %182 = vst [vmem:[%s599_s3 + $0x68] sm:$0xff] %v151_v12  ;;  %v124_v23 = vadd.f32 %v93_v21, %v62_v20  ;;  %v104_v12 = vld [vmem:[%s597_s1 + $0xe0] sm:$0xff]  ;;  %v44_v20 = vld [vmem:[%s598_s2 + $0xf0] sm:$0x1f] }
  0x72   :  { %v155_v32 = vadd.f32 %v124_v23, %v31_v19 }
  0x77   :  { %v63_v25 = vld [vmem:[%s596_s0 + $0x90] sm:$0xff] }
  0x78   :  { %183 = vst [vmem:[%s599_s3 + $0x70] sm:$0xff] %v152_v17  ;;  %v125_v28 = vadd.f32 %v94_v26, %v63_v25  ;;  %v105_v17 = vld [vmem:[%s597_s1 + $0xe8] sm:$0xff] }
  0x7a   :  { %v156_v37 = vadd.f32 %v125_v28, %v32_v24 }
  0x7f   :  { %v64_v30 = vld [vmem:[%s596_s0 + $0x98] sm:$0xff] }
  0x80   :  { %184 = vst [vmem:[%s599_s3 + $0x78] sm:$0xff] %v153_v22  ;;  %v126_v33 = vadd.f32 %v95_v31, %v64_v30  ;;  %v106_v22 = vld [vmem:[%s597_s1 + $0xf0] sm:$0x1f] }
  0x82   :  { %v157_v42 = vadd.f32 %v126_v33, %v33_v29 }
  0x87   :  { %v65_v35 = vld [vmem:[%s596_s0 + $0xa0] sm:$0xff] }
  0x88   :  { %185 = vst [vmem:[%s599_s3 + $0x80] sm:$0xff] %v154_v27  ;;  %v127_v38 = vadd.f32 %v96_v36, %v65_v35 }
  0x8a   :  { %v158_v47 = vadd.f32 %v127_v38, %v34_v34 }
  0x8f   :  { %v66_v40 = vld [vmem:[%s596_s0 + $0xa8] sm:$0xff] }
  0x90   :  { %186 = vst [vmem:[%s599_s3 + $0x88] sm:$0xff] %v155_v32  ;;  %v128_v43 = vadd.f32 %v97_v41, %v66_v40 }
  0x92   :  { %v159_v52 = vadd.f32 %v128_v43, %v35_v39 }
  0x97   :  { %v67_v45 = vld [vmem:[%s596_s0 + $0xb0] sm:$0xff] }
  0x98   :  { %187 = vst [vmem:[%s599_s3 + $0x90] sm:$0xff] %v156_v37  ;;  %v129_v48 = vadd.f32 %v98_v46, %v67_v45 }
  0x9a   :  { %v160_v57 = vadd.f32 %v129_v48, %v36_v44 }
  0x9f   :  { %v68_v50 = vld [vmem:[%s596_s0 + $0xb8] sm:$0xff] }
  0xa0   :  { %188 = vst [vmem:[%s599_s3 + $0x98] sm:$0xff] %v157_v42  ;;  %v130_v53 = vadd.f32 %v99_v51, %v68_v50 }
  0xa2   :  { %v161_v62 = vadd.f32 %v130_v53, %v37_v49 }
  0xa7   :  { %v69_v55 = vld [vmem:[%s596_s0 + $0xc0] sm:$0xff] }
  0xa8   :  { %189 = vst [vmem:[%s599_s3 + $0xa0] sm:$0xff] %v158_v47  ;;  %v131_v58 = vadd.f32 %v100_v56, %v69_v55 }
  0xaa   :  { %v162_v3 = vadd.f32 %v131_v58, %v38_v54 }
  0xaf   :  { %v70_v60 = vld [vmem:[%s596_s0 + $0xc8] sm:$0xff] }
  0xb0   :  { %190 = vst [vmem:[%s599_s3 + $0xa8] sm:$0xff] %v159_v52  ;;  %v132_v63 = vadd.f32 %v101_v61, %v70_v60 }
  0xb2   :  { %v163_v8 = vadd.f32 %v132_v63, %v39_v59 }
  0xb7   :  { %v71_v1 = vld [vmem:[%s596_s0 + $0xd0] sm:$0xff] }
  0xb8   :  { %191 = vst [vmem:[%s599_s3 + $0xb0] sm:$0xff] %v160_v57  ;;  %v133_v4 = vadd.f32 %v102_v2, %v71_v1 }
  0xba   :  { %v164_v13 = vadd.f32 %v133_v4, %v40_v0 }
  0xbf   :  { %v72_v6 = vld [vmem:[%s596_s0 + $0xd8] sm:$0xff] }
  0xc0   :  { %192 = vst [vmem:[%s599_s3 + $0xb8] sm:$0xff] %v161_v62  ;;  %v134_v9 = vadd.f32 %v103_v7, %v72_v6 }
  0xc2   :  { %v165_v18 = vadd.f32 %v134_v9, %v41_v5 }
  0xc7   :  { %v73_v11 = vld [vmem:[%s596_s0 + $0xe0] sm:$0xff] }
  0xc8   :  { %193 = vst [vmem:[%s599_s3 + $0xc0] sm:$0xff] %v162_v3  ;;  %v135_v14 = vadd.f32 %v104_v12, %v73_v11 }
  0xca   :  { %v166_v23 = vadd.f32 %v135_v14, %v42_v10 }
  0xcf   :  { %v74_v16 = vld [vmem:[%s596_s0 + $0xe8] sm:$0xff] }
  0xd0   :  { %194 = vst [vmem:[%s599_s3 + $0xc8] sm:$0xff] %v163_v8  ;;  %v136_v19 = vadd.f32 %v105_v17, %v74_v16 }
  0xd2   :  { %v167_v25 = vadd.f32 %v136_v19, %v43_v15 }
  0xd7   :  { %v75_v21 = vld [vmem:[%s596_s0 + $0xf0] sm:$0x1f] }
  0xd8   :  { %195 = vst [vmem:[%s599_s3 + $0xd0] sm:$0xff] %v164_v13  ;;  %v137_v24 = vadd.f32 %v106_v22, %v75_v21  ;;  %196 = vst [vmem:[%s599_s3 + $0xd8] sm:$0xff] %v165_v18 }
  0xd9   :  { %197 = vst [vmem:[%s599_s3 + $0xe0] sm:$0xff] %v166_v23  ;;  %198 = vst [vmem:[%s599_s3 + $0xe8] sm:$0xff] %v167_v25 }
  0xda   :  { %v168_v26 = vadd.f32 %v137_v24, %v44_v20 }
  0xdc   :  { %199 = vst [vmem:[%s599_s3 + $0xf0] sm:$0x1f] %v168_v26 }

</bundles_post_ra>
